<compile_context>
chip_gen: v7x
topology: tpu7x:2x2x1
jax: 0.10.0
libtpu: 0.0.40
codegen_flags: <defaults>
</compile_context>

<pallas_src>
import functools

import jax
import jax.numpy as jnp
from jax import lax
from jax.experimental import pallas as pl
from jax.experimental.pallas import tpu as pltpu


def down_kernel(x_ref, w1_ref, sb1_ref, w2_ref, sb2_ref, o_ref):
    # x_ref  : (1, 2, 2, Hp, Wp, Cin)  the four 2x2 pool taps, channels-last
    # w1_ref : (9*Cin,  Cout)          conv1 im2col weights, row = (3*dy+dx)*Cin + c
    # sb1_ref: (2, Cout) f32           [scale, shift] = folded conv1 bias + BN1
    # w2_ref : (9*Cout, Cout)          conv2 im2col weights
    # sb2_ref: (2, Cout) f32
    # o_ref  : (1, Cout, Hp*Wp) f32    NCHW-flattened output (lane-dense store)
    _, _, _, Hp, Wp, Cin = x_ref.shape
    Cout = o_ref.shape[1]

    x = x_ref[...]  # one contiguous load of the whole block
    # ---- MaxPool2d((2, 2)): element-wise max of the 4 pre-separated taps ----
    pooled = jnp.maximum(jnp.maximum(x[0, 0, 0], x[0, 0, 1]),
                         jnp.maximum(x[0, 1, 0], x[0, 1, 1]))  # (Hp, Wp, Cin)

    def conv3x3_bn_relu(act, w_ref, sb_ref):
        """act: (Hp, Wp, C) -> (Hp*Wp, Cout) f32 after conv + bias + BN + ReLU."""
        c = act.shape[-1]
        # zero 'same' padding built on register values (no scratch, no zero sweeps)
        zr = jnp.zeros((1, Wp, c), act.dtype)
        zc = jnp.zeros((Hp + 2, 1, c), act.dtype)
        p = jnp.concatenate([zr, act, zr], axis=0)           # (Hp+2, Wp,   C)
        p = jnp.concatenate([zc, p, zc], axis=1)             # (Hp+2, Wp+2, C)
        # im2col: the 9 shifted taps stacked along the channel (lane) axis
        taps = [p[dy:dy + Hp, dx:dx + Wp, :]
                for dy in range(3) for dx in range(3)]
        patches = jnp.concatenate(taps, axis=-1).reshape(Hp * Wp, 9 * c)
        # single MXU matmul per conv, f32 accumulation
        acc = jnp.dot(patches, w_ref[...], preferred_element_type=jnp.float32)
        sb = sb_ref[...]
        # folded (conv bias + eval-mode BatchNorm) scale/shift, then ReLU (f32 VPU)
        return jnp.maximum(acc * sb[0:1, :] + sb[1:2, :], 0.0)

    # TODO(synk): Dropout is eval-mode identity (PyTorch's train-mode RNG stream
    # cannot be reproduced); BatchNorm uses running statistics (eval mode).
    a1 = conv3x3_bn_relu(pooled, w1_ref, sb1_ref)            # (Hp*Wp, Cout) f32
    a1 = a1.astype(w2_ref.dtype).reshape(Hp, Wp, Cout)       # bf16 for 2nd matmul
    a2 = conv3x3_bn_relu(a1, w2_ref, sb2_ref)                # (Hp*Wp, Cout) f32

    # Store transposed: lane axis = Hp*Wp (dense), already NCHW-flattened order.
    o_ref[0] = a2.T


def _fold_bn(conv_bias, bn, eps):
    """Fold conv bias + eval-mode BatchNorm into (scale, shift), shape (2, C)."""
    scale = bn["gamma"] / jnp.sqrt(bn["var"] + eps)
    shift = bn["beta"] + scale * (conv_bias - bn["mean"])
    return jnp.stack([scale, shift]).astype(jnp.float32)


@functools.partial(jax.jit, static_argnames=("matmul_dtype", "eps"))
def down_forward(x_nchw, w1, b1, bn1, w2, b2, bn2,
                 matmul_dtype=jnp.bfloat16, eps=1e-5):
    """x_nchw: (N, Cin, H, W); w1: (3,3,Cin,Cout) HWIO; w2: (3,3,Cout,Cout) HWIO."""
    N, Cin, H, W = x_nchw.shape
    Cout = w1.shape[-1]
    assert H % 2 == 0 and W % 2 == 0, "MaxPool2d(2,2) requires even H and W"
    Hp, Wp = H // 2, W // 2

    # Single input-layout transform: separate the 2x2 pool taps and put channels
    # last:  (N, Cin, H, W) -> (N, 2, 2, Hp, Wp, Cin).
    xt = x_nchw.reshape(N, Cin, Hp, 2, Wp, 2)
    xt = jnp.transpose(xt, (0, 3, 5, 2, 4, 1)).astype(matmul_dtype)

    w1k = w1.reshape(9 * Cin, Cout).astype(matmul_dtype)     # row = (3*dy+dx)*Cin + c
    w2k = w2.reshape(9 * Cout, Cout).astype(matmul_dtype)
    sb1 = _fold_bn(b1, bn1, eps)
    sb2 = _fold_bn(b2, bn2, eps)

    out = pl.pallas_call(
        down_kernel,
        out_shape=jax.ShapeDtypeStruct((N, Cout, Hp * Wp), jnp.float32),
        grid=(N,),
        in_specs=[
            pl.BlockSpec((1, 2, 2, Hp, Wp, Cin), lambda n: (n, 0, 0, 0, 0, 0)),
            pl.BlockSpec((9 * Cin, Cout), lambda n: (0, 0)),
            pl.BlockSpec((2, Cout), lambda n: (0, 0)),
            pl.BlockSpec((9 * Cout, Cout), lambda n: (0, 0)),
            pl.BlockSpec((2, Cout), lambda n: (0, 0)),
        ],
        out_specs=pl.BlockSpec((1, Cout, Hp * Wp), lambda n: (n, 0, 0)),
        compiler_params=pltpu.CompilerParams(dimension_semantics=("parallel",)),
    )(xt, w1k, sb1, w2k, sb2)

    # Output is already NCHW-flattened; only a free reshape remains.
    return out.reshape(N, Cout, Hp, Wp)


def down_reference(x_nchw, w1, b1, bn1, w2, b2, bn2,
                   matmul_dtype=jnp.float32, eps=1e-5):
    """Pure-JAX reference (eval-mode semantics).  With matmul_dtype=bf16 the conv
    operands get the same bf16 rounding the kernel's MXU path uses, so the
    comparison is tight; accumulation stays f32 in both."""
    x = jnp.transpose(x_nchw, (0, 2, 3, 1))
    pooled = lax.reduce_window(x, -jnp.inf, lax.max,
                               (1, 2, 2, 1), (1, 2, 2, 1), "VALID")

    def block(h, w, b, bn):
        hq = h.astype(matmul_dtype).astype(jnp.float32)
        wq = w.astype(matmul_dtype).astype(jnp.float32)
        y = lax.conv_general_dilated(hq, wq, (1, 1), "SAME",
                                     dimension_numbers=("NHWC", "HWIO", "NHWC")) + b
        y = (y - bn["mean"]) / jnp.sqrt(bn["var"] + eps) * bn["gamma"] + bn["beta"]
        return jnp.maximum(y, 0.0)

    y = block(pooled, w1, b1, bn1)
    y = block(y, w2, b2, bn2)
    return jnp.transpose(y, (0, 3, 1, 2))


if __name__ == "__main__":
    N, Cin, Cout, H, W = 2, 4, 8, 16, 16

    key = jax.random.PRNGKey(0)
    ks = jax.random.split(key, 11)

    x = jax.random.normal(ks[0], (N, Cin, H, W), jnp.float32)

    # Deterministic synthetic parameters (HWIO conv weights; a real PyTorch
    # checkpoint in OIHW would be transposed with (2, 3, 1, 0) first).
    w1 = 0.1 * jax.random.normal(ks[1], (3, 3, Cin, Cout), jnp.float32)
    b1 = 0.1 * jax.random.normal(ks[2], (Cout,), jnp.float32)
    w2 = 0.1 * jax.random.normal(ks[3], (3, 3, Cout, Cout), jnp.float32)
    b2 = 0.1 * jax.random.normal(ks[4], (Cout,), jnp.float32)
    bn1 = {"gamma": jax.random.uniform(ks[5], (Cout,), jnp.float32, 0.5, 1.5),
           "beta": 0.1 * jax.random.normal(ks[6], (Cout,), jnp.float32),
           "mean": 0.1 * jax.random.normal(ks[7], (Cout,), jnp.float32),
           "var": jax.random.uniform(ks[8], (Cout,), jnp.float32, 0.5, 1.5)}
    bn2 = {"gamma": jax.random.uniform(ks[9], (Cout,), jnp.float32, 0.5, 1.5),
           "beta": 0.1 * jax.random.normal(ks[10], (Cout,), jnp.float32),
           "mean": jnp.zeros((Cout,), jnp.float32),
           "var": jnp.ones((Cout,), jnp.float32)}

    out = jax.block_until_ready(down_forward(x, w1, b1, bn1, w2, b2, bn2))
    assert out.shape == (N, Cout, H // 2, W // 2), out.shape

    # Reference with matched bf16 operand rounding (same MXU precision policy):
    # any layout / tap-ordering / BN-folding bug would show up as O(0.1+) error.
    ref = jax.block_until_ready(
        down_reference(x, w1, b1, bn1, w2, b2, bn2, matmul_dtype=jnp.bfloat16))
    max_err = float(jnp.max(jnp.abs(out - ref)))
    assert jnp.allclose(out, ref, rtol=5e-3, atol=5e-3), max_err

    print("KERNEL_OK")
</pallas_src>

<mosaic_0001>
module attributes {stable_mosaic.version = 11 : i64} {
  func.func @down_kernel(%arg0: i32, %arg1: memref<1x2x2x8x8x4xbf16, #tpu.memory_space<vmem>>, %arg2: memref<36x8xbf16, #tpu.memory_space<vmem>>, %arg3: memref<2x8xf32, #tpu.memory_space<vmem>>, %arg4: memref<72x8xbf16, #tpu.memory_space<vmem>>, %arg5: memref<2x8xf32, #tpu.memory_space<vmem>>, %arg6: memref<1x8x64xf32, #tpu.memory_space<vmem>>) attributes {dimension_semantics = [#tpu.dimension_semantics<parallel>], iteration_bounds = array<i64: 2>, scalar_prefetch = 0 : i64, scratch_operands = 0 : i64, tpu.core_type = #tpu.core_type<tc>, window_params = [{transform_indices = @transform_0, window_bounds = array<i64: 1, 2, 2, 8, 8, 4>}, {pipeline_mode = #tpu.pipeline_mode<synchronous>, transform_indices = @transform_1, window_bounds = array<i64: 36, 8>}, {pipeline_mode = #tpu.pipeline_mode<synchronous>, transform_indices = @transform_2, window_bounds = array<i64: 2, 8>}, {pipeline_mode = #tpu.pipeline_mode<synchronous>, transform_indices = @transform_3, window_bounds = array<i64: 72, 8>}, {pipeline_mode = #tpu.pipeline_mode<synchronous>, transform_indices = @transform_4, window_bounds = array<i64: 2, 8>}, {transform_indices = @transform_5, window_bounds = array<i64: 1, 8, 64>}]} {
    %c0 = arith.constant 0 : index
    %c0_0 = arith.constant 0 : index
    %c0_1 = arith.constant 0 : index
    %c0_2 = arith.constant 0 : index
    %c0_3 = arith.constant 0 : index
    %c0_4 = arith.constant 0 : index
    %0 = vector.load %arg1[%c0, %c0_0, %c0_1, %c0_2, %c0_3, %c0_4] : memref<1x2x2x8x8x4xbf16, #tpu.memory_space<vmem>>, vector<1x2x2x8x8x4xbf16>
    %1 = vector.extract_strided_slice %0 {offsets = [0, 0, 0, 0, 0, 0], sizes = [1, 1, 1, 8, 8, 4], strides = [1, 1, 1, 1, 1, 1]} : vector<1x2x2x8x8x4xbf16> to vector<1x1x1x8x8x4xbf16>
    %2 = vector.shape_cast %1 : vector<1x1x1x8x8x4xbf16> to vector<8x8x4xbf16>
    %3 = vector.extract_strided_slice %0 {offsets = [0, 0, 1, 0, 0, 0], sizes = [1, 1, 1, 8, 8, 4], strides = [1, 1, 1, 1, 1, 1]} : vector<1x2x2x8x8x4xbf16> to vector<1x1x1x8x8x4xbf16>
    %4 = vector.shape_cast %3 : vector<1x1x1x8x8x4xbf16> to vector<8x8x4xbf16>
    %5 = arith.maximumf %2, %4 : vector<8x8x4xbf16>
    %6 = vector.extract_strided_slice %0 {offsets = [0, 1, 0, 0, 0, 0], sizes = [1, 1, 1, 8, 8, 4], strides = [1, 1, 1, 1, 1, 1]} : vector<1x2x2x8x8x4xbf16> to vector<1x1x1x8x8x4xbf16>
    %7 = vector.shape_cast %6 : vector<1x1x1x8x8x4xbf16> to vector<8x8x4xbf16>
    %8 = vector.extract_strided_slice %0 {offsets = [0, 1, 1, 0, 0, 0], sizes = [1, 1, 1, 8, 8, 4], strides = [1, 1, 1, 1, 1, 1]} : vector<1x2x2x8x8x4xbf16> to vector<1x1x1x8x8x4xbf16>
    %9 = vector.shape_cast %8 : vector<1x1x1x8x8x4xbf16> to vector<8x8x4xbf16>
    %10 = arith.maximumf %7, %9 : vector<8x8x4xbf16>
    %11 = arith.maximumf %5, %10 : vector<8x8x4xbf16>
    %cst = arith.constant 0.000000e+00 : bf16
    %12 = vector.broadcast %cst : bf16 to vector<1x8x4xbf16>
    %cst_5 = arith.constant 0.000000e+00 : bf16
    %13 = vector.broadcast %cst_5 : bf16 to vector<10x1x4xbf16>
    %14 = tpu.concatenate %12, %11, %12 in 0 : vector<1x8x4xbf16>, vector<8x8x4xbf16>, vector<1x8x4xbf16> -> vector<10x8x4xbf16>
    %15 = tpu.concatenate %13, %14, %13 in 1 : vector<10x1x4xbf16>, vector<10x8x4xbf16>, vector<10x1x4xbf16> -> vector<10x10x4xbf16>
    %16 = vector.extract_strided_slice %15 {offsets = [0, 0, 0], sizes = [8, 8, 4], strides = [1, 1, 1]} : vector<10x10x4xbf16> to vector<8x8x4xbf16>
    %17 = vector.extract_strided_slice %15 {offsets = [0, 1, 0], sizes = [8, 8, 4], strides = [1, 1, 1]} : vector<10x10x4xbf16> to vector<8x8x4xbf16>
    %18 = vector.extract_strided_slice %15 {offsets = [0, 2, 0], sizes = [8, 8, 4], strides = [1, 1, 1]} : vector<10x10x4xbf16> to vector<8x8x4xbf16>
    %19 = vector.extract_strided_slice %15 {offsets = [1, 0, 0], sizes = [8, 8, 4], strides = [1, 1, 1]} : vector<10x10x4xbf16> to vector<8x8x4xbf16>
    %20 = vector.extract_strided_slice %15 {offsets = [1, 1, 0], sizes = [8, 8, 4], strides = [1, 1, 1]} : vector<10x10x4xbf16> to vector<8x8x4xbf16>
    %21 = vector.extract_strided_slice %15 {offsets = [1, 2, 0], sizes = [8, 8, 4], strides = [1, 1, 1]} : vector<10x10x4xbf16> to vector<8x8x4xbf16>
    %22 = vector.extract_strided_slice %15 {offsets = [2, 0, 0], sizes = [8, 8, 4], strides = [1, 1, 1]} : vector<10x10x4xbf16> to vector<8x8x4xbf16>
    %23 = vector.extract_strided_slice %15 {offsets = [2, 1, 0], sizes = [8, 8, 4], strides = [1, 1, 1]} : vector<10x10x4xbf16> to vector<8x8x4xbf16>
    %24 = vector.extract_strided_slice %15 {offsets = [2, 2, 0], sizes = [8, 8, 4], strides = [1, 1, 1]} : vector<10x10x4xbf16> to vector<8x8x4xbf16>
    %25 = tpu.concatenate %16, %17, %18, %19, %20, %21, %22, %23, %24 in 2 : vector<8x8x4xbf16>, vector<8x8x4xbf16>, vector<8x8x4xbf16>, vector<8x8x4xbf16>, vector<8x8x4xbf16>, vector<8x8x4xbf16>, vector<8x8x4xbf16>, vector<8x8x4xbf16>, vector<8x8x4xbf16> -> vector<8x8x36xbf16>
    %26 = vector.shape_cast %25 : vector<8x8x36xbf16> to vector<64x36xbf16>
    %c0_6 = arith.constant 0 : index
    %c0_7 = arith.constant 0 : index
    %27 = vector.load %arg2[%c0_6, %c0_7] : memref<36x8xbf16, #tpu.memory_space<vmem>>, vector<36x8xbf16>
    %cst_8 = arith.constant dense<0.000000e+00> : vector<64x8xf32>
    %28 = tpu.matmul %26, %27, %cst_8 {dimension_numbers = #tpu.dot_dimension_numbers<[1], [0], [0], [1], [0, 0, 1, 1], [], []>} : vector<64x36xbf16>, vector<36x8xbf16>, vector<64x8xf32> -> vector<64x8xf32>
    %c0_9 = arith.constant 0 : index
    %c0_10 = arith.constant 0 : index
    %29 = vector.load %arg3[%c0_9, %c0_10] : memref<2x8xf32, #tpu.memory_space<vmem>>, vector<2x8xf32>
    %30 = vector.extract_strided_slice %29 {offsets = [0, 0], sizes = [1, 8], strides = [1, 1]} : vector<2x8xf32> to vector<1x8xf32>
    %31 = vector.broadcast %30 : vector<1x8xf32> to vector<64x8xf32>
    %32 = arith.mulf %28, %31 : vector<64x8xf32>
    %33 = vector.extract_strided_slice %29 {offsets = [1, 0], sizes = [1, 8], strides = [1, 1]} : vector<2x8xf32> to vector<1x8xf32>
    %34 = vector.broadcast %33 : vector<1x8xf32> to vector<64x8xf32>
    %35 = arith.addf %32, %34 : vector<64x8xf32>
    %cst_11 = arith.constant 0.000000e+00 : f32
    %36 = vector.broadcast %cst_11 : f32 to vector<64x8xf32>
    %37 = arith.maximumf %35, %36 : vector<64x8xf32>
    %38 = arith.truncf %37 : vector<64x8xf32> to vector<64x8xbf16>
    %39 = vector.shape_cast %38 : vector<64x8xbf16> to vector<8x8x8xbf16>
    %cst_12 = arith.constant 0.000000e+00 : bf16
    %40 = vector.broadcast %cst_12 : bf16 to vector<1x8x8xbf16>
    %cst_13 = arith.constant 0.000000e+00 : bf16
    %41 = vector.broadcast %cst_13 : bf16 to vector<10x1x8xbf16>
    %42 = tpu.concatenate %40, %39, %40 in 0 : vector<1x8x8xbf16>, vector<8x8x8xbf16>, vector<1x8x8xbf16> -> vector<10x8x8xbf16>
    %43 = tpu.concatenate %41, %42, %41 in 1 : vector<10x1x8xbf16>, vector<10x8x8xbf16>, vector<10x1x8xbf16> -> vector<10x10x8xbf16>
    %44 = vector.extract_strided_slice %43 {offsets = [0, 0, 0], sizes = [8, 8, 8], strides = [1, 1, 1]} : vector<10x10x8xbf16> to vector<8x8x8xbf16>
    %45 = vector.extract_strided_slice %43 {offsets = [0, 1, 0], sizes = [8, 8, 8], strides = [1, 1, 1]} : vector<10x10x8xbf16> to vector<8x8x8xbf16>
    %46 = vector.extract_strided_slice %43 {offsets = [0, 2, 0], sizes = [8, 8, 8], strides = [1, 1, 1]} : vector<10x10x8xbf16> to vector<8x8x8xbf16>
    %47 = vector.extract_strided_slice %43 {offsets = [1, 0, 0], sizes = [8, 8, 8], strides = [1, 1, 1]} : vector<10x10x8xbf16> to vector<8x8x8xbf16>
    %48 = vector.extract_strided_slice %43 {offsets = [1, 1, 0], sizes = [8, 8, 8], strides = [1, 1, 1]} : vector<10x10x8xbf16> to vector<8x8x8xbf16>
    %49 = vector.extract_strided_slice %43 {offsets = [1, 2, 0], sizes = [8, 8, 8], strides = [1, 1, 1]} : vector<10x10x8xbf16> to vector<8x8x8xbf16>
    %50 = vector.extract_strided_slice %43 {offsets = [2, 0, 0], sizes = [8, 8, 8], strides = [1, 1, 1]} : vector<10x10x8xbf16> to vector<8x8x8xbf16>
    %51 = vector.extract_strided_slice %43 {offsets = [2, 1, 0], sizes = [8, 8, 8], strides = [1, 1, 1]} : vector<10x10x8xbf16> to vector<8x8x8xbf16>
    %52 = vector.extract_strided_slice %43 {offsets = [2, 2, 0], sizes = [8, 8, 8], strides = [1, 1, 1]} : vector<10x10x8xbf16> to vector<8x8x8xbf16>
    %53 = tpu.concatenate %44, %45, %46, %47, %48, %49, %50, %51, %52 in 2 : vector<8x8x8xbf16>, vector<8x8x8xbf16>, vector<8x8x8xbf16>, vector<8x8x8xbf16>, vector<8x8x8xbf16>, vector<8x8x8xbf16>, vector<8x8x8xbf16>, vector<8x8x8xbf16>, vector<8x8x8xbf16> -> vector<8x8x72xbf16>
    %54 = vector.shape_cast %53 : vector<8x8x72xbf16> to vector<64x72xbf16>
    %c0_14 = arith.constant 0 : index
    %c0_15 = arith.constant 0 : index
    %55 = vector.load %arg4[%c0_14, %c0_15] : memref<72x8xbf16, #tpu.memory_space<vmem>>, vector<72x8xbf16>
    %cst_16 = arith.constant dense<0.000000e+00> : vector<64x8xf32>
    %56 = tpu.matmul %54, %55, %cst_16 {dimension_numbers = #tpu.dot_dimension_numbers<[1], [0], [0], [1], [0, 0, 1, 1], [], []>} : vector<64x72xbf16>, vector<72x8xbf16>, vector<64x8xf32> -> vector<64x8xf32>
    %c0_17 = arith.constant 0 : index
    %c0_18 = arith.constant 0 : index
    %57 = vector.load %arg5[%c0_17, %c0_18] : memref<2x8xf32, #tpu.memory_space<vmem>>, vector<2x8xf32>
    %58 = vector.extract_strided_slice %57 {offsets = [0, 0], sizes = [1, 8], strides = [1, 1]} : vector<2x8xf32> to vector<1x8xf32>
    %59 = vector.broadcast %58 : vector<1x8xf32> to vector<64x8xf32>
    %60 = arith.mulf %56, %59 : vector<64x8xf32>
    %61 = vector.extract_strided_slice %57 {offsets = [1, 0], sizes = [1, 8], strides = [1, 1]} : vector<2x8xf32> to vector<1x8xf32>
    %62 = vector.broadcast %61 : vector<1x8xf32> to vector<64x8xf32>
    %63 = arith.addf %60, %62 : vector<64x8xf32>
    %cst_19 = arith.constant 0.000000e+00 : f32
    %64 = vector.broadcast %cst_19 : f32 to vector<64x8xf32>
    %65 = arith.maximumf %63, %64 : vector<64x8xf32>
    %66 = tpu.transpose %65, [1, 0] : vector<64x8xf32> -> vector<8x64xf32>
    %c0_20 = arith.constant 0 : index
    %c0_21 = arith.constant 0 : index
    %c0_22 = arith.constant 0 : index
    %67 = vector.load %arg6[%c0_20, %c0_21, %c0_22] : memref<1x8x64xf32, #tpu.memory_space<vmem>>, vector<1x8x64xf32>
    %68 = vector.shape_cast %67 : vector<1x8x64xf32> to vector<8x64xf32>
    %69 = vector.shape_cast %66 : vector<8x64xf32> to vector<1x8x64xf32>
    tpu.vector_store %arg6[%c0_20, %c0_21, %c0_22], %69 {strides = array<i32>} : memref<1x8x64xf32, #tpu.memory_space<vmem>>, vector<1x8x64xf32>,
    return
  }
  func.func @transform_0(%arg0: i32) -> (i32, i32, i32, i32, i32, i32) {
    %c0_i32 = arith.constant 0 : i32
    %c0_i32_0 = arith.constant 0 : i32
    %c0_i32_1 = arith.constant 0 : i32
    %c0_i32_2 = arith.constant 0 : i32
    %c0_i32_3 = arith.constant 0 : i32
    %c0_i32_4 = arith.constant 0 : i32
    return %arg0, %c0_i32, %c0_i32_0, %c0_i32_1, %c0_i32_2, %c0_i32_3 : i32, i32, i32, i32, i32, i32
  }
  func.func @transform_1(%arg0: i32) -> (i32, i32) {
    %c0_i32 = arith.constant 0 : i32
    %c0_i32_0 = arith.constant 0 : i32
    %c0_i32_1 = arith.constant 0 : i32
    return %c0_i32, %c0_i32_0 : i32, i32
  }
  func.func @transform_2(%arg0: i32) -> (i32, i32) {
    %c0_i32 = arith.constant 0 : i32
    %c0_i32_0 = arith.constant 0 : i32
    %c0_i32_1 = arith.constant 0 : i32
    return %c0_i32, %c0_i32_0 : i32, i32
  }
  func.func @transform_3(%arg0: i32) -> (i32, i32) {
    %c0_i32 = arith.constant 0 : i32
    %c0_i32_0 = arith.constant 0 : i32
    %c0_i32_1 = arith.constant 0 : i32
    return %c0_i32, %c0_i32_0 : i32, i32
  }
  func.func @transform_4(%arg0: i32) -> (i32, i32) {
    %c0_i32 = arith.constant 0 : i32
    %c0_i32_0 = arith.constant 0 : i32
    %c0_i32_1 = arith.constant 0 : i32
    return %c0_i32, %c0_i32_0 : i32, i32
  }
  func.func @transform_5(%arg0: i32) -> (i32, i32, i32) {
    %c0_i32 = arith.constant 0 : i32
    %c0_i32_0 = arith.constant 0 : i32
    %c0_i32_1 = arith.constant 0 : i32
    return %arg0, %c0_i32, %c0_i32_0 : i32, i32, i32
  }
}

</mosaic_0001>

<bundles_post_ra>
// kernel: down_forward.1
= control target key start
LH: loop header
LB: loop body
LE: loop exit
PB: predicated region body
PF: predicated region fallthrough
CT: control target
= control target key end

     0   :  { %s1751_s18 = smov 0   ;;  %s2395_s0 = inlined_call_operand.vmem [shape: bf16[2,2,2,8,8,4], index: 0, kind: input, shape index: {}]   ;;  %s2396_s1 = inlined_call_operand.vmem [shape: bf16[36,8], index: 1, kind: input, shape index: {}]   ;;  %s2397_s2 = inlined_call_operand.vmem [shape: f32[2,8], index: 2, kind: input, shape index: {}]   ;;  %s2398_s3 = inlined_call_operand.vmem [shape: bf16[72,8], index: 3, kind: input, shape index: {}]   ;;  %s2399_s4 = inlined_call_operand.vmem [shape: f32[2,8], index: 4, kind: input, shape index: {}]   ;;  %s2400_s5 = inlined_call_operand.vmem [shape: f32[2,8,64], index: 5, kind: output, shape index: {}]  }
   0x1 LB: > { %s1569_s19 = sadd.s32 4294967295, %s1706_s18   ;;  %p1573_p0 = scmp.ge.s32.totalorder %s1706_s18, 1  ;;  %s1706_s18 = sphi %s1751_s18, %s15_s18  }
   0x2   : > { %p187_p1 = scmp.lt.s32.totalorder %s1706_s18, 3 }
   0x4   : > { %p188_p2 = pnand %p1573_p0, %p187_p1 }
   0x5   : > { %vm352_vm0 = vcmask (!%p188_p2), 1040384   ;;  %vm353_vm1 = vsmask.f32 (!%p188_p2), 256  ;;  %vm364_vm2 = vcmask (!%p188_p2), 1044480   ;;  %v1708_v0 = vmov (!%p188_p2), 0   ;;  %p214_p3 = scmp.lt.s32.totalorder (!%p188_p2), %s1569_s19, 1 }
   0x6   : > { %191 = sbr.rel (%p188_p2) target bundleno = 1021 (0x3fd), region = 40  ;;  %v283_v1 = vrot.slane (!%p188_p2), %v1708_v0, 7  ;;  %vm1759_vm3 = vmand (!%p188_p2), %vm352_vm0, %vm353_vm1  ;;  %vm365_vm4 = vsmask.f32 (!%p188_p2), 4352  ;;  %s1709_s24 = smov (!%p188_p2), 8   ;;  %vm774_vm6 = vcmask (!%p188_p2), 1041408  }
   0x7   : > { %vm1763_vm5 = vmand (!%p188_p2), %vm364_vm2, %vm365_vm4  ;;  %s1710_s25 = smov (!%p188_p2), 4   ;;  %s1711_s26 = smov (!%p188_p2), 12   ;;  %vm585_vm7 = vcmask (!%p188_p2), 31744   ;;  %vm602_vm8 = vcmask (!%p188_p2), 64512   ;;  %vm619_vm9 = vcmask (!%p188_p2), 97280   ;;  %vm636_vm10 = vcmask (!%p188_p2), 130048  }
   0x8   : > { %v355_v4 = vsel (!%p188_p2), %vm1759_vm3, 0, %v283_v1  ;;  %s1712_s27 = smov (!%p188_p2), 16   ;;  %s1713_s28 = smov (!%p188_p2), 20   ;;  %vm653_vm11 = vcmask (!%p188_p2), 162816   ;;  %vm670_vm12 = vcmask (!%p188_p2), 195584   ;;  %vm687_vm13 = vcmask (!%p188_p2), 228352  }
   0x9   : > { %v1773_v5 = vsel (!%p188_p2), %vm1763_vm5, %v355_v4, 0  ;;  %s1714_s29 = smov (!%p188_p2), 24   ;;  %s1715_s7 = smov (!%p188_p2), 28   ;;  %vm704_vm14 = vcmask (!%p188_p2), 261120   ;;  %vm761_vm15 = vcmask (!%p188_p2), 293888   ;;  %v1698_v3 = vld [vmem:[%s2398_s3 + $0x18] sm:$0xff] (!%p188_p2)  }
   0xa   : > { %v1776_v6 = vrot.slane (!%p188_p2), %v1773_v5, 1  ;;  %v377_v7 = vshrl.u32 (!%p188_p2), %v1773_v5, 16  ;;  %v379_v8 = vshll.u32 (!%p188_p2), %v1773_v5, 16  ;;  %s1716_s12 = smov (!%p188_p2), 32   ;;  %s1717_s13 = smov (!%p188_p2), 48   ;;  %vm1381_vm0 = vcmask (!%p188_p2), 1043456  }
   0xb   : > { %s1718_s14 = smov (!%p188_p2), 56   ;;  %s1719_s17 = smov (!%p188_p2), 40   ;;  %vm1244_vm1 = vcmask (!%p188_p2), 326656   ;;  %vm1261_vm2 = vcmask (!%p188_p2), 392192   ;;  %vm1295_vm4 = vcmask (!%p188_p2), 523264  }
   0xc   : > { %464 = vrot.lane.b32.xlu0 (!%p188_p2), %v1776_v6, %s1709_s24  ;;  %v381_v9 = vrot.slane (!%p188_p2), %v379_v8, 1 }
   0xd   : > { %s2406_s19 = smov (!%p214_p3, %s1569_s19), 1 }
   0xe   : > { %s1611_s20 = sshll.u32 %s2406_s19, 7  ;;  %v1793_v16 = vor.u32 %v381_v9, %v377_v7  ;;  %s1576_s8 = sshll.u32 %s2406_s19, 3 }
   0xf   : > { %s1784_s23 = scalar_lea.vmem %s2395_s0, %s1611_s20  ;;  %s1720_s20 = smov 64  }
  0x10   : > { %v225_v10 = vld [vmem:[%s1784_s23 + $0x4] sm:$0xf]  ;;  %v224_v15 = vld [vmem:[%s1784_s23] sm:$0xf]  ;;  %v227_v23 = vld [vmem:[%s1784_s23 + $0xc] sm:$0xf]  ;;  %432 = vrot.lane.b32.xlu0 %v1793_v16, %s1710_s25  ;;  %s222_s11 = scalar_lea.vmem %s2400_s5, %s1576_s8 }
  0x11   : > { %v233_v11 = vld [vmem:[%s1784_s23 + $0x24] sm:$0xf]  ;;  %v232_v18 = vld [vmem:[%s1784_s23 + $0x20] sm:$0xf]  ;;  %v235_v24 = vld [vmem:[%s1784_s23 + $0x2c] sm:$0xf] }
  0x12   : > { %v241_v12 = vld [vmem:[%s1784_s23 + $0x44] sm:$0xf]  ;;  %v257_v14 = vmax.bf16 %v233_v11, %v225_v10  ;;  %v240_v19 = vld [vmem:[%s1784_s23 + $0x40] sm:$0xf]  ;;  %v256_v21 = vmax.bf16 %v232_v18, %v224_v15  ;;  %v243_v25 = vld [vmem:[%s1784_s23 + $0x4c] sm:$0xf]  ;;  %v259_v28 = vmax.bf16 %v235_v24, %v227_v23 }
  0x13   : > { %v249_v13 = vld [vmem:[%s1784_s23 + $0x64] sm:$0xf]  ;;  %v248_v20 = vld [vmem:[%s1784_s23 + $0x60] sm:$0xf]  ;;  %v251_v27 = vld [vmem:[%s1784_s23 + $0x6c] sm:$0xf] }
  0x14   : > { %v265_v17 = vmax.bf16 %v249_v13, %v241_v12  ;;  %v264_v22 = vmax.bf16 %v248_v20, %v240_v19  ;;  %v226_v29 = vld [vmem:[%s1784_s23 + $0x8] sm:$0xf]  ;;  %v267_v32 = vmax.bf16 %v251_v27, %v243_v25  ;;  %v228_v18 = vld [vmem:[%s1784_s23 + $0x10] sm:$0xf]  ;;  %v237_v27 = vld [vmem:[%s1784_s23 + $0x34] sm:$0xf] }
  0x15   : > { %v234_v30 = vld [vmem:[%s1784_s23 + $0x28] sm:$0xf]  ;;  %v236_v19 = vld [vmem:[%s1784_s23 + $0x30] sm:$0xf] }
  0x16   : > { %v273_v26 = vmax.bf16 %v265_v17, %v257_v14  ;;  %v272_v31 = vmax.bf16 %v264_v22, %v256_v21  ;;  %v242_v33 = vld [vmem:[%s1784_s23 + $0x48] sm:$0xf]  ;;  %v258_v35 = vmax.bf16 %v234_v30, %v226_v29  ;;  %v275_v41 = vmax.bf16 %v267_v32, %v259_v28  ;;  %v244_v20 = vld [vmem:[%s1784_s23 + $0x50] sm:$0xf]  ;;  %v253_v32 = vld [vmem:[%s1784_s23 + $0x74] sm:$0xf] }
  0x17   : > { %v250_v34 = vld [vmem:[%s1784_s23 + $0x68] sm:$0xf]  ;;  %v252_v21 = vld [vmem:[%s1784_s23 + $0x70] sm:$0xf]  ;;  %v260_v24 = vmax.bf16 %v236_v19, %v228_v18  ;;  %v231_v18 = vld [vmem:[%s1784_s23 + $0x1c] sm:$0xf] }
  0x18   : > { %v295_v36 = vshrl.u32 %v273_v26, 16  ;;  %v298_v37 = vshll.u32 %v273_v26, 16  ;;  %v266_v38 = vmax.bf16 %v250_v34, %v242_v33  ;;  %v288_v39 = vshrl.u32 %v272_v31, 16  ;;  %v229_v26 = vld [vmem:[%s1784_s23 + $0x14] sm:$0xf] }
  0x19   : > { %v291_v40 = vshll.u32 %v272_v31, 16  ;;  %v309_v45 = vshrl.u32 %v275_v41, 16  ;;  %v312_v46 = vshll.u32 %v275_v41, 16  ;;  %v268_v25 = vmax.bf16 %v252_v21, %v244_v20  ;;  %v245_v31 = vld [vmem:[%s1784_s23 + $0x54] sm:$0xf] }
  0x1a   : > { %v297_v42 = vrot.slane %v295_v36, 7  ;;  %v274_v43 = vmax.bf16 %v266_v38, %v258_v35  ;;  %v290_v44 = vrot.slane %v288_v39, 7  ;;  %v261_v33 = vmax.bf16 %v237_v27, %v229_v26  ;;  %v238_v39 = vld [vmem:[%s1784_s23 + $0x38] sm:$0xf]  ;;  %v239_v19 = vld [vmem:[%s1784_s23 + $0x3c] sm:$0xf] }
  0x1b   : > { %v311_v51 = vrot.slane %v309_v45, 7  ;;  %v276_v30 = vmax.bf16 %v268_v25, %v260_v24  ;;  %v269_v34 = vmax.bf16 %v253_v32, %v245_v31  ;;  %v254_v41 = vld [vmem:[%s1784_s23 + $0x78] sm:$0xf]  ;;  %v247_v20 = vld [vmem:[%s1784_s23 + $0x5c] sm:$0xf]  ;;  %v263_v25 = vmax.bf16 %v239_v19, %v231_v18 }
  0x1c   : > { %v300_v47 = vor.u32 %v298_v37, %v297_v42  ;;  %v302_v48 = vshrl.u32 %v274_v43, 16  ;;  %v305_v49 = vshll.u32 %v274_v43, 16  ;;  %v293_v50 = vor.u32 %v291_v40, %v290_v44  ;;  %v230_v37 = vld [vmem:[%s1784_s23 + $0x18] sm:$0xf] }
  0x1d   : > { %v314_v56 = vor.u32 %v312_v46, %v311_v51  ;;  %v316_v36 = vshrl.u32 %v276_v30, 16  ;;  %v277_v38 = vmax.bf16 %v269_v34, %v261_v33  ;;  %v246_v40 = vld [vmem:[%s1784_s23 + $0x58] sm:$0xf]  ;;  %v319_v43 = vshll.u32 %v276_v30, 16 }
  0x1e   : > { %v357_v52 = vsel %vm1759_vm3, 0, %v300_v47  ;;  %v304_v53 = vrot.slane %v302_v48, 7  ;;  %v356_v55 = vsel %vm1759_vm3, 0, %v293_v50  ;;  %v262_v44 = vmax.bf16 %v238_v39, %v230_v37 }
  0x1f   : > { %v1812_v54 = vsel %vm1763_vm5, %v357_v52, 0  ;;  %v1820_v57 = vsel %vm1763_vm5, %v356_v55, 0  ;;  %v359_v59 = vsel %vm1759_vm3, 0, %v314_v56  ;;  %v318_v42 = vrot.slane %v316_v36, 7 }
  0x20   : > { %483 = vrot.lane.b32.xlu1 %v1812_v54, %s1711_s26  ;;  %v307_v58 = vor.u32 %v305_v49, %v304_v53  ;;  %481 = vrot.lane.b32.xlu0 %v1820_v57, %s1711_s26  ;;  %v386_v60 = vshll.u32 %v1820_v57, 16  ;;  %v1829_v61 = vsel %vm1763_vm5, %v359_v59, 0  ;;  %v1840_v0 = vrot.slane %v1812_v54, 1  ;;  %v1692_v59 = vld [vmem:[%s2396_s1] sm:$0xff]  }
  0x21   : > { %v457_v1 = vrot.slane %v1820_v57, 1  ;;  %v393_v4 = vshll.u32 %v1812_v54, 16  ;;  %v384_v7 = vshrl.u32 %v1820_v57, 16  ;;  %v391_v10 = vshrl.u32 %v1812_v54, 16  ;;  %1636 = vmatprep.subr.bf16.mxu0 %v1692_v59 }
  0x22   : > { %v358_v62 = vsel %vm1759_vm3, 0, %v307_v58  ;;  %v388_v8 = vrot.slane %v386_v60, 1  ;;  %v407_v23 = vshll.u32 %v1829_v61, 16  ;;  %v405_v28 = vshrl.u32 %v1829_v61, 16  ;;  %1637 = vmatpush3.bf16.msra.mxu0 %v1692_v59 }
  0x23   : > { %v1835_v63 = vsel %vm1763_vm5, %v358_v62, 0  ;;  %v395_v11 = vrot.slane %v393_v4, 1  ;;  %v270_v45 = vmax.bf16 %v254_v41, %v246_v40  ;;  %v323_v46 = vshrl.u32 %v277_v38, 16 }
  0x24   : > { %487 = vrot.lane.b32.xlu1 %v1829_v61, %s1711_s26  ;;  %485 = vrot.lane.b32.xlu0 %v1835_v63, %s1711_s26  ;;  %v1849_v9 = vrot.slane %v1835_v63, 1  ;;  %v400_v12 = vshll.u32 %v1835_v63, 16  ;;  %v389_v13 = vor.u32 %v388_v8, %v384_v7  ;;  %v398_v15 = vshrl.u32 %v1835_v63, 16  ;;  %v1693_v8 = vld [vmem:[%s2396_s1 + $0x8] sm:$0xff]  }
  0x25   : > { %v396_v14 = vor.u32 %v395_v11, %v391_v10  ;;  %v409_v29 = vrot.slane %v407_v23, 1  ;;  %v1892_v47 = vrot.slane %v1829_v61, 1  ;;  %v321_v48 = vor.u32 %v319_v43, %v318_v42  ;;  %1638 = vmatprep.subr.bf16.mxu0 %v1693_v8  ;;  %v255_v23 = vld [vmem:[%s1784_s23 + $0x7c] sm:$0xf] }
  0x26   : > { %v402_v17 = vrot.slane %v400_v12, 1  ;;  %v278_v49 = vmax.bf16 %v270_v45, %v262_v44  ;;  %v325_v50 = vrot.slane %v323_v46, 7  ;;  %v326_v51 = vshll.u32 %v277_v38, 16  ;;  %1639 = vmatpush3.bf16.msra.mxu0 %v1693_v8 }
  0x27   : > { %v1878_v35 = vor.u32 %v409_v29, %v405_v28  ;;  %v360_v52 = vsel %vm1759_vm3, 0, %v321_v48  ;;  %v271_v26 = vmax.bf16 %v255_v23, %v247_v20 }
  0x28   : > { %466 = vrot.lane.b32.xlu1 %v457_v1, %s1709_s24  ;;  %468 = vrot.lane.b32.xlu0 %v1840_v0, %s1709_s24  ;;  %v1864_v22 = vor.u32 %v402_v17, %v398_v15  ;;  %v330_v53 = vshrl.u32 %v278_v49, 16  ;;  %v1904_v55 = vsel %vm1763_vm5, %v360_v52, 0  ;;  %v328_v56 = vor.u32 %v326_v51, %v325_v50 }
  0x29   : > { %v414_v58 = vshll.u32 %v1904_v55, 16  ;;  %v333_v62 = vshll.u32 %v278_v49, 16  ;;  %v412_v4 = vshrl.u32 %v1904_v55, 16  ;;  %v461_v28 = vrot.slane %v1904_v55, 1 }
  0x2a   : > { %v332_v60 = vrot.slane %v330_v53, 7  ;;  %v279_v31 = vmax.bf16 %v271_v26, %v263_v25 }
  0x2b   : > { %v416_v7 = vrot.slane %v414_v58, 1 }
  0x2c   : > { %470 = vrot.lane.b32.xlu1 %v1849_v9, %s1709_s24  ;;  %434 = vrot.lane.b32.xlu0 %v389_v13, %s1710_s25  ;;  %v335_v11 = vor.u32 %v333_v62, %v332_v60  ;;  %v337_v32 = vshrl.u32 %v279_v31, 16 }
  0x2d   : > { %v417_v12 = vor.u32 %v416_v7, %v412_v4 }
  0x2e   : > { %v362_v15 = vsel %vm1759_vm3, 0, %v335_v11  ;;  %v339_v34 = vrot.slane %v337_v32, 7 }
  0x30   : > { %436 = vrot.lane.b32.xlu1 %v396_v14, %s1710_s25  ;;  %504 = vrot.lane.b32.xlu0 %v389_v13, %s1712_s27  ;;  %v1694_v13 = vld [vmem:[%s2396_s1 + $0x10] ss:$0 sps:$4 sm:$0x33]  }
  0x31   : > { %1668 = vmatprep.subr.msk.bf16.mxu0 %vm774_vm6, %v1694_v13  ;;  %v776_v17 = vsel %vm774_vm6, %v1694_v13, 0 }
  0x32   : > { %1641 = vmatpush3.bf16.msra.mxu0 %v776_v17 }
  0x34   : > { %438 = vrot.lane.b32.xlu1 %v1864_v22, %s1710_s25  ;;  %508 = vrot.lane.b32.xlu0 %v1864_v22, %s1712_s27 }
  0x38   : > { %506 = vrot.lane.b32.xlu1 %v396_v14, %s1712_s27  ;;  %521 = vrot.lane.b32.xlu0 %v457_v1, %s1713_s28  ;;  %v361_v1 = vsel %vm1759_vm3, 0, %v328_v56 }
  0x39   : > { %v1925_v10 = vsel %vm1763_vm5, %v361_v1, 0 }
  0x3a   : > { %v419_v21 = vshrl.u32 %v1925_v10, 16  ;;  %v462_v33 = vrot.slane %v1925_v10, 1 }
  0x3c   : > { %510 = vrot.lane.b32.xlu1 %v1878_v35, %s1712_s27  ;;  %525 = vrot.lane.b32.xlu0 %v1849_v9, %s1713_s28 }
  0x40   : > { %523 = vrot.lane.b32.xlu1 %v1840_v0, %s1713_s28  ;;  %537 = vrot.lane.b32.xlu0 %v1812_v54, %s1714_s29 }
  0x44   : > { %527 = vrot.lane.b32.xlu1 %v1892_v47, %s1713_s28  ;;  %541 = vrot.lane.b32.xlu0 %v1829_v61, %s1714_s29 }
  0x48   : > { %539 = vrot.lane.b32.xlu1 %v1835_v63, %s1714_s29  ;;  %553 = vrot.lane.b32.xlu0 %v396_v14, %s1715_s7  ;;  %v421_v14 = vshll.u32 %v1925_v10, 16 }
  0x4c   : > { %543 = vrot.lane.b32.xlu1 %v1904_v55, %s1714_s29  ;;  %557 = vrot.lane.b32.xlu0 %v1878_v35, %s1715_s7 }
  0x50   : > { %555 = vrot.lane.b32.xlu1 %v1864_v22, %s1715_s7  ;;  %569 = vrot.lane.b32.xlu0 %v1840_v0, %s1716_s12  ;;  %v423_v22 = vrot.slane %v421_v14, 1  ;;  %v1946_v0 = vsel %vm1763_vm5, %v362_v15, 0 }
  0x51   : > { %v428_v24 = vshll.u32 %v1946_v0, 16  ;;  %v426_v29 = vshrl.u32 %v1946_v0, 16  ;;  %v463_v36 = vrot.slane %v1946_v0, 1 }
  0x52   : > { %v424_v27 = vor.u32 %v423_v22, %v419_v21 }
  0x53   : > { %v430_v30 = vrot.slane %v428_v24, 1 }
  0x54   : > { %559 = vrot.lane.b32.xlu1 %v417_v12, %s1715_s7  ;;  %440 = vrot.lane.b32.xlu0 %v1878_v35, %s1710_s25  ;;  %v340_v35 = vshll.u32 %v279_v31, 16 }
  0x56   : > { %v342_v37 = vor.u32 %v340_v35, %v339_v34 }
  0x58   : > { %571 = vrot.lane.b32.xlu1 %v1849_v9, %s1716_s12  ;;  %573 = vrot.lane.b32.xlu0 %v1892_v47, %s1716_s12  ;;  %v431_v9 = vor.u32 %v430_v30, %v426_v29  ;;  %v363_v38 = vsel %vm1759_vm3, 0, %v342_v37 }
  0x59   : > { %v375_v39 = vsel %vm1763_vm5, %v363_v38, 0 }
  0x5a   : > { %v500_v40 = vshll.u32 %v375_v39, 16  ;;  %v498_v41 = vshrl.u32 %v375_v39, 16  ;;  %v520_v44 = vrot.slane %v375_v39, 1 }
  0x5c   : > { %442 = vrot.lane.b32.xlu1 %v417_v12, %s1710_s25  ;;  %444 = vrot.lane.b32.xlu0 %v424_v27, %s1710_s25  ;;  %v502_v42 = vrot.slane %v500_v40, 1 }
  0x5e   : > { %v503_v43 = vor.u32 %v502_v42, %v498_v41 }
  0x60   : > { %575 = vrot.lane.b32.xlu1 %v461_v28, %s1716_s12  ;;  %472 = vrot.lane.b32.xlu0 %v1892_v47, %s1709_s24 }
  0x64   : > { %446 = vrot.lane.b32.xlu1 %v431_v9, %s1710_s25  ;;  %476 = vrot.lane.b32.xlu0 %v462_v33, %s1709_s24 }
  0x68   : > { %474 = vrot.lane.b32.xlu1 %v461_v28, %s1709_s24  ;;  %489 = vrot.lane.b32.xlu0 %v1904_v55, %s1711_s26 }
  0x6c   : > { %478 = vrot.lane.b32.xlu1 %v463_v36, %s1709_s24  ;;  %493 = vrot.lane.b32.xlu0 %v1946_v0, %s1711_s26 }
  0x70   : > { %491 = vrot.lane.b32.xlu1 %v1925_v10, %s1711_s26  ;;  %512 = vrot.lane.b32.xlu0 %v417_v12, %s1712_s27 }
  0x74   : > { %495 = vrot.lane.b32.xlu1 %v375_v39, %s1711_s26  ;;  %516 = vrot.lane.b32.xlu0 %v431_v9, %s1712_s27 }
  0x78   : > { %514 = vrot.lane.b32.xlu1 %v424_v27, %s1712_s27  ;;  %529 = vrot.lane.b32.xlu0 %v461_v28, %s1713_s28 }
  0x7c   : > { %518 = vrot.lane.b32.xlu1 %v503_v43, %s1712_s27  ;;  %533 = vrot.lane.b32.xlu0 %v463_v36, %s1713_s28 }
  0x7e   : > { %v465_v45 = vpop.permute.xlu0 %464 }
  0x80   : > { %531 = vrot.lane.b32.xlu1 %v462_v33, %s1713_s28  ;;  %545 = vrot.lane.b32.xlu0 %v1925_v10, %s1714_s29 }
  0x82   : > { %v433_v46 = vpop.permute.xlu0 %432 }
  0x83   : > { %v587_v20 = vsel %vm585_vm7, %v1773_v5, %v433_v46 }
  0x84   : > { %535 = vrot.lane.b32.xlu1 %v520_v44, %s1713_s28  ;;  %549 = vrot.lane.b32.xlu0 %v375_v39, %s1714_s29  ;;  %v604_v23 = vsel %vm602_vm8, %v587_v20, %v465_v45 }
  0x88   : > { %547 = vrot.lane.b32.xlu1 %v1946_v0, %s1714_s29  ;;  %561 = vrot.lane.b32.xlu0 %v424_v27, %s1715_s7 }
  0x8c   : > { %551 = vrot.lane.b32.xlu1 %v1773_v5, %s1714_s29  ;;  %565 = vrot.lane.b32.xlu0 %v503_v43, %s1715_s7 }
  0x90   : > { %563 = vrot.lane.b32.xlu1 %v431_v9, %s1715_s7  ;;  %577 = vrot.lane.b32.xlu0 %v462_v33, %s1716_s12 }
  0x92   : > { %v484_v47 = vpop.permute.xlu1 %483  ;;  %v482_v48 = vpop.permute.xlu0 %481 }
  0x93   : > { %v621_v26 = vsel %vm619_vm9, %v604_v23, %v482_v48 }
  0x94   : > { %567 = vrot.lane.b32.xlu1 %v1793_v16, %s1715_s7  ;;  %581 = vrot.lane.b32.xlu0 %v520_v44, %s1716_s12 }
  0x96   : > { %v2000_v49 = vpop.permute.xlu1 %487  ;;  %v486_v50 = vpop.permute.xlu0 %485 }
  0x98   : > { %579 = vrot.lane.b32.xlu1 %v463_v36, %s1716_s12  ;;  %1029 = vrot.lane.b32.xlu0 %v1793_v16, %s1709_s24 }
  0x9a   : > { %v467_v51 = vpop.permute.xlu1 %466  ;;  %v469_v52 = vpop.permute.xlu0 %468 }
  0x9c   : > { %583 = vrot.lane.b32.xlu1 %v1776_v6, %s1716_s12  ;;  %1059 = vrot.lane.b32.xlu0 %v1776_v6, %s1712_s27 }
  0x9e   : > { %v471_v53 = vpop.permute.xlu1 %470  ;;  %v435_v56 = vpop.permute.xlu0 %434 }
  0x9f   : > { %v589_v21 = vsel %vm585_vm7, %v1820_v57, %v435_v56 }
  0xa0   : > { %v606_v24 = vsel %vm602_vm8, %v589_v21, %v467_v51  ;;  %1146 = vrot.lane.b32.xlu1 %v1773_v5, %s1717_s13 }
  0xa1   : > { %v623_v28 = vsel %vm619_vm9, %v606_v24, %v484_v47 }
  0xa2   : > { %v437_v58 = vpop.permute.xlu1 %436  ;;  %v505_v59 = vpop.permute.xlu0 %504 }
  0xa3   : > { %v591_v27 = vsel %vm585_vm7, %v1812_v54, %v437_v58  ;;  %v638_v57 = vsel %vm636_vm10, %v621_v26, %v505_v59 }
  0xa4   : > { %v608_v54 = vsel %vm602_vm8, %v591_v27, %v469_v52  ;;  %1162 = vrot.lane.b32.xlu1 %v1793_v16, %s1718_s14 }
  0xa5   : > { %v625_v42 = vsel %vm619_vm9, %v608_v54, %v486_v50 }
  0xa6   : > { %v439_v60 = vpop.permute.xlu1 %438  ;;  %v509_v62 = vpop.permute.xlu0 %508 }
  0xa7   : > { %v593_v9 = vsel %vm585_vm7, %v1835_v63, %v439_v60  ;;  %v642_v46 = vsel %vm636_vm10, %v625_v42, %v509_v62 }
  0xa8   : > { %v610_v39 = vsel %vm602_vm8, %v593_v9, %v471_v53 }
  0xa9   : > { %v627_v44 = vsel %vm619_vm9, %v610_v39, %v2000_v49 }
  0xaa   : > { %v507_v1 = vpop.permute.xlu1 %506  ;;  %v522_v4 = vpop.permute.xlu0 %521 }
  0xab   : > { %v640_v30 = vsel %vm636_vm10, %v623_v28, %v507_v1  ;;  %v655_v32 = vsel %vm653_vm11, %v638_v57, %v522_v4 }
  0xae   : > { %v511_v7 = vpop.permute.xlu1 %510  ;;  %v526_v8 = vpop.permute.xlu0 %525 }
  0xaf   : > { %v644_v47 = vsel %vm636_vm10, %v627_v44, %v511_v7  ;;  %v659_v51 = vsel %vm653_vm11, %v642_v46, %v526_v8 }
  0xb2   : > { %v524_v11 = vpop.permute.xlu1 %523  ;;  %v538_v12 = vpop.permute.xlu0 %537 }
  0xb3   : > { %v657_v33 = vsel %vm653_vm11, %v640_v30, %v524_v11  ;;  %v672_v34 = vsel %vm670_vm12, %v655_v32, %v538_v12 }
  0xb6   : > { %v528_v13 = vpop.permute.xlu1 %527  ;;  %v542_v14 = vpop.permute.xlu0 %541 }
  0xb7   : > { %v661_v52 = vsel %vm653_vm11, %v644_v47, %v528_v13  ;;  %v676_v53 = vsel %vm670_vm12, %v659_v51, %v542_v14 }
  0xba   : > { %v540_v15 = vpop.permute.xlu1 %539  ;;  %v554_v17 = vpop.permute.xlu0 %553 }
  0xbb   : > { %v674_v35 = vsel %vm670_vm12, %v657_v33, %v540_v15  ;;  %v689_v36 = vsel %vm687_vm13, %v672_v34, %v554_v17 }
  0xbe   : > { %v544_v18 = vpop.permute.xlu1 %543  ;;  %v558_v19 = vpop.permute.xlu0 %557 }
  0xbf   : > { %v678_v50 = vsel %vm670_vm12, %v661_v52, %v544_v18  ;;  %v693_v56 = vsel %vm687_vm13, %v676_v53, %v558_v19 }
  0xc2   : > { %v556_v22 = vpop.permute.xlu1 %555  ;;  %v570_v25 = vpop.permute.xlu0 %569 }
  0xc3   : > { %v691_v37 = vsel %vm687_vm13, %v674_v35, %v556_v22  ;;  %v706_v63 = vsel %vm704_vm14, %v689_v36, %v570_v25 }
  0xc6   : > { %v560_v29 = vpop.permute.xlu1 %559  ;;  %v441_v31 = vpop.permute.xlu0 %440 }
  0xc7   : > { %v695_v49 = vsel %vm687_vm13, %v678_v50, %v560_v29  ;;  %v595_v9 = vsel %vm585_vm7, %v1829_v61, %v441_v31 }
  0xca   : > { %v572_v38 = vpop.permute.xlu1 %571  ;;  %v574_v41 = vpop.permute.xlu0 %573 }
  0xcb   : > { %v708_v40 = vsel %vm704_vm14, %v691_v37, %v572_v38  ;;  %v710_v59 = vsel %vm704_vm14, %v693_v56, %v574_v41 }
  0xcc   : > { %v1577_v43 = vcombine.low %v706_v63, %v708_v40 }
  0xce   : > { %v443_v45 = vpop.permute.xlu1 %442  ;;  %1642 = vmatprep.mubr.msk.bf16.mxu0 %vm761_vm15, %v1577_v43  ;;  %v445_v48 = vpop.permute.xlu0 %444 }
  0xcf   : > { %v597_v32 = vsel %vm585_vm7, %v1904_v55, %v443_v45  ;;  %v599_v34 = vsel %vm585_vm7, %v1925_v10, %v445_v48 }
  0xd2   : > { %v576_v58 = vpop.permute.xlu1 %575  ;;  %v473_v62 = vpop.permute.xlu0 %472 }
  0xd3   : > { %v712_v60 = vsel %vm704_vm14, %v695_v49, %v576_v58  ;;  %v612_v33 = vsel %vm602_vm8, %v595_v9, %v473_v62 }
  0xd4   : > { %v1578_v1 = vcombine.low %v710_v59, %v712_v60 }
  0xd6   : > { %v447_v4 = vpop.permute.xlu1 %446  ;;  %1643 = vmatmul.mubr.msk.bf16.vlgmr.msra.gmra.mrb[0].mxu0 %vm761_vm15, %v1578_v1  ;;  %v477_v7 = vpop.permute.xlu0 %476 }
  0xd7   : > { %v601_v55 = vsel %vm585_vm7, %v1946_v0, %v447_v4  ;;  %v616_v40 = vsel %vm602_vm8, %v599_v34, %v477_v7 }
  0xda   : > { %v475_v8 = vpop.permute.xlu1 %474  ;;  %v490_v11 = vpop.permute.xlu0 %489 }
  0xdb   : > { %v614_v54 = vsel %vm602_vm8, %v597_v32, %v475_v8  ;;  %v629_v35 = vsel %vm619_vm9, %v612_v33, %v490_v11  ;;  %v844_v11 = vlaneseq }
  0xde   : > { %v479_v12 = vpop.permute.xlu1 %478  ;;  %v494_v13 = vpop.permute.xlu0 %493 }
  0xdf   : > { %v618_v10 = vsel %vm602_vm8, %v601_v55, %v479_v12  ;;  %v633_v43 = vsel %vm619_vm9, %v616_v40, %v494_v13  ;;  %v2090_v12 = vshrl.u32 %v844_v11, 7 }
  0xe1   : > { %v846_v13 = vsub.s32 0, %v2090_v12 }
  0xe2   : > { %v492_v14 = vpop.permute.xlu1 %491  ;;  %v513_v15 = vpop.permute.xlu0 %512 }
  0xe3   : > { %v631_v36 = vsel %vm619_vm9, %v614_v54, %v492_v14  ;;  %v646_v39 = vsel %vm636_vm10, %v629_v35, %v513_v15  ;;  %v843_v14 = vld [vmem:[%s2397_s2] sm:$0x3]  ;;  %v858_v15 = vsub.s32 1, %v2090_v12 }
  0xe6   : > { %v496_v17 = vpop.permute.xlu1 %495  ;;  %v517_v18 = vpop.permute.xlu0 %516 }
  0xe7   : > { %v635_v44 = vsel %vm619_vm9, %v618_v10, %v496_v17  ;;  %v650_v47 = vsel %vm636_vm10, %v633_v43, %v517_v18  ;;  %v2099_v17 = vrot.slane %v843_v14, %v846_v13  ;;  %v2103_v18 = vrot.slane %v843_v14, %v858_v15 }
  0xea   : > { %v515_v19 = vpop.permute.xlu1 %514  ;;  %v530_v20 = vpop.permute.xlu0 %529 }
  0xeb   : > { %v648_v61 = vsel %vm636_vm10, %v631_v36, %v515_v19  ;;  %v663_v31 = vsel %vm653_vm11, %v646_v39, %v530_v20 }
  0xee   : > { %v519_v21 = vpop.permute.xlu1 %518  ;;  %v534_v22 = vpop.permute.xlu0 %533 }
  0xef   : > { %v652_v48 = vsel %vm636_vm10, %v635_v44, %v519_v21  ;;  %v667_v53 = vsel %vm653_vm11, %v650_v47, %v534_v22 }
  0xf2   : > { %v532_v23 = vpop.permute.xlu1 %531  ;;  %v546_v24 = vpop.permute.xlu0 %545 }
  0xf3   : > { %v665_v63 = vsel %vm653_vm11, %v648_v61, %v532_v23  ;;  %v680_v41 = vsel %vm670_vm12, %v663_v31, %v546_v24 }
  0xf6   : > { %v536_v25 = vpop.permute.xlu1 %535  ;;  %v550_v26 = vpop.permute.xlu0 %549 }
  0xf7   : > { %v669_v50 = vsel %vm653_vm11, %v652_v48, %v536_v25  ;;  %v684_v58 = vsel %vm670_vm12, %v667_v53, %v550_v26 }
  0xfa   : > { %v548_v27 = vpop.permute.xlu1 %547  ;;  %v562_v28 = vpop.permute.xlu0 %561 }
  0xfb   : > { %v682_v42 = vsel %vm670_vm12, %v665_v63, %v548_v27  ;;  %v697_v45 = vsel %vm687_vm13, %v680_v41, %v562_v28 }
  0xfe   : > { %v552_v29 = vpop.permute.xlu1 %551  ;;  %v566_v57 = vpop.permute.xlu0 %565 }
  0xff   : > { %v686_v59 = vsel %vm670_vm12, %v669_v50, %v552_v29  ;;  %v701_v60 = vsel %vm687_vm13, %v684_v58, %v566_v57 }
 0x102   : > { %v564_v30 = vpop.permute.xlu1 %563  ;;  %v578_v37 = vpop.permute.xlu0 %577 }
 0x103   : > { %v699_v0 = vsel %vm687_vm13, %v682_v42, %v564_v30  ;;  %v714_v51 = vsel %vm704_vm14, %v697_v45, %v578_v37 }
 0x106   : > { %v568_v38 = vpop.permute.xlu1 %567  ;;  %v582_v56 = vpop.permute.xlu0 %581 }
 0x107   : > { %v703_v62 = vsel %vm687_vm13, %v686_v59, %v568_v38  ;;  %v718_v4 = vsel %vm704_vm14, %v701_v60, %v582_v56 }
 0x10a   : > { %v580_v46 = vpop.permute.xlu1 %579 }
 0x10b   : > { %v716_v52 = vsel %vm704_vm14, %v699_v0, %v580_v46 }
 0x10c   : > { %v1579_v49 = vcombine.low %v714_v51, %v716_v52 }
 0x10e   : > { %v584_v1 = vpop.permute.xlu1 %583  ;;  %1646 = vmatprep.mubr.msk.bf16.mxu0 %vm761_vm15, %v1579_v49 }
 0x10f   : > { %v720_v7 = vsel %vm704_vm14, %v703_v62, %v584_v1 }
 0x110   : > { %v1580_v8 = vcombine.low %v718_v4, %v720_v7 }
 0x112   : > { %1647 = vmatmul.mubr.msk.bf16.gmra.mrb[4].mxu0 %vm761_vm15, %v1580_v8 }
 0x1a9   : > { %v1644_v16 = vpop.f32.mrb[0].mxu0 }
 0x1aa   : > { %v850_v19 = vmul.f32 %v1644_v16, %v2099_v17  ;;  %v812_v20 = vpop.f32.mrb[1].mxu0 }
 0x1ab   : > { %v848_v21 = vmul.f32 %v2099_v17, %v812_v20  ;;  %v1645_v22 = vpop.f32.mrb[2].mxu0 }
 0x1ac   : > { %v862_v23 = vadd.f32 %v2103_v18, %v850_v19  ;;  %v851_v24 = vmul.f32 %v1645_v22, %v2099_v17  ;;  %v815_v25 = vpop.f32.mrb[3].mxu0 }
 0x1ad   : > { %v860_v26 = vadd.f32 %v2103_v18, %v848_v21  ;;  %v849_v29 = vmul.f32 %v2099_v17, %v815_v25 }
 0x1ae   : > { %v870_v27 = vmax.f32 %v862_v23, 0.0  ;;  %v863_v28 = vadd.f32 %v2103_v18, %v851_v24 }
 0x1af   : > { %v868_v57 = vmax.f32 %v860_v26, 0.0  ;;  %v861_v34 = vadd.f32 %v2103_v18, %v849_v29 }
 0x1b0   : > { %v1614_v30 = vpack.c.bf16 %v870_v27, %v870_v27  ;;  %v871_v9 = vmax.f32 %v863_v28, 0.0 }
 0x1b1   : > { %v1612_v32 = vpack.c.bf16 %v868_v57, %v868_v57  ;;  %v869_v63 = vmax.f32 %v861_v34, 0.0 }
 0x1b2   : > { %v915_v33 = vshrl.u32 %v1614_v30, 16  ;;  %v1615_v54 = vpack.c.bf16 %v871_v9, %v871_v9  ;;  %v918_v37 = vshll.u32 %v1614_v30, 16 }
 0x1b3   : > { %v901_v35 = vshrl.u32 %v1612_v32, 16  ;;  %v904_v61 = vshll.u32 %v1612_v32, 16  ;;  %v1613_v44 = vpack.c.bf16 %v869_v63, %v869_v63 }
 0x1b4   : > { %v917_v36 = vrot.slane %v915_v33, 7  ;;  %v922_v38 = vshrl.u32 %v1615_v54, 16  ;;  %v925_v10 = vshll.u32 %v1615_v54, 16 }
 0x1b5   : > { %v903_v39 = vrot.slane %v901_v35, 7  ;;  %v908_v47 = vshrl.u32 %v1613_v44, 16  ;;  %v911_v53 = vshll.u32 %v1613_v44, 16 }
 0x1b6   : > { %v920_v55 = vor.u32 %v918_v37, %v917_v36  ;;  %v924_v31 = vrot.slane %v922_v38, 7 }
 0x1b7   : > { %v906_v40 = vor.u32 %v904_v61, %v903_v39  ;;  %v910_v52 = vrot.slane %v908_v47, 7 }
 0x1b8   : > { %v966_v41 = vsel %vm1759_vm3, 0, %v920_v55  ;;  %v927_v43 = vor.u32 %v925_v10, %v924_v31 }
 0x1b9   : > { %v2117_v42 = vsel %vm1763_vm5, %v966_v41, 0  ;;  %v964_v45 = vsel %vm1759_vm3, 0, %v906_v40  ;;  %v913_v50 = vor.u32 %v911_v53, %v910_v52 }
 0x1ba   : > { %1134 = vrot.lane.b32.xlu1 %v2117_v42, %s1717_s13  ;;  %1080 = vrot.lane.b32.xlu0 %v2117_v42, %s1714_s29  ;;  %v1054_v0 = vrot.slane %v2117_v42, 1  ;;  %v2128_v46 = vsel %vm1763_vm5, %v964_v45, 0  ;;  %v967_v48 = vsel %vm1759_vm3, 0, %v927_v43  ;;  %v997_v60 = vshll.u32 %v2117_v42, 16 }
 0x1bb   : > { %v2137_v51 = vsel %vm1763_vm5, %v967_v48, 0  ;;  %v1052_v56 = vrot.slane %v2128_v46, 1  ;;  %v965_v49 = vsel %vm1759_vm3, 0, %v913_v50  ;;  %v995_v4 = vshrl.u32 %v2117_v42, 16 }
 0x1bc   : > { %v2152_v58 = vsel %vm1763_vm5, %v965_v49, 0  ;;  %v1055_v59 = vrot.slane %v2137_v51, 1  ;;  %v999_v1 = vrot.slane %v997_v60, 1  ;;  %v983_v8 = vshll.u32 %v2128_v46, 16 }
 0x1bd   : > { %v1053_v62 = vrot.slane %v2152_v58, 1  ;;  %v1004_v14 = vshll.u32 %v2137_v51, 16  ;;  %v981_v16 = vshrl.u32 %v2128_v46, 16  ;;  %v1002_v21 = vshrl.u32 %v2137_v51, 16 }
 0x1be   : > { %1065 = vrot.lane.b32.xlu1 %v1054_v0, %s1712_s27  ;;  %1076 = vrot.lane.b32.xlu0 %v2128_v46, %s1714_s29  ;;  %v1000_v7 = vor.u32 %v999_v1, %v995_v4  ;;  %v985_v11 = vrot.slane %v983_v8, 1  ;;  %v990_v31 = vshll.u32 %v2152_v58, 16 }
 0x1bf   : > { %v1006_v20 = vrot.slane %v1004_v14, 1  ;;  %v1695_v14 = vld [vmem:[%s2398_s3] sm:$0xff]  }
 0x1c0   : > { %v986_v19 = vor.u32 %v985_v11, %v981_v16  ;;  %v992_v43 = vrot.slane %v990_v31, 1  ;;  %1650 = vmatprep.subr.bf16.mxu1 %v1695_v14 }
 0x1c1   : > { %v1007_v22 = vor.u32 %v1006_v20, %v1002_v21  ;;  %1651 = vmatpush3.bf16.msra.mxu1 %v1695_v14  ;;  %v1697_v21 = vld [vmem:[%s2398_s3 + $0x10] sm:$0xff]  }
 0x1c2   : > { %1120 = vrot.lane.b32.xlu0 %v1054_v0, %s1719_s17  ;;  %1082 = vrot.lane.b32.xlu1 %v2137_v51, %s1714_s29 }
 0x1c6   : > { %1136 = vrot.lane.b32.xlu0 %v2137_v51, %s1717_s13  ;;  %1166 = vrot.lane.b32.xlu1 %v1054_v0, %s1720_s20  ;;  %v988_v0 = vshrl.u32 %v2152_v58, 16 }
 0x1c8   : > { %v993_v47 = vor.u32 %v992_v43, %v988_v0 }
 0x1ca   : > { %1116 = vrot.lane.b32.xlu0 %v1052_v56, %s1719_s17  ;;  %1061 = vrot.lane.b32.xlu1 %v1052_v56, %s1712_s27 }
 0x1ce   : > { %1132 = vrot.lane.b32.xlu0 %v2152_v58, %s1717_s13  ;;  %1078 = vrot.lane.b32.xlu1 %v2152_v58, %s1714_s29 }
 0x1d2   : > { %1168 = vrot.lane.b32.xlu0 %v1055_v59, %s1720_s20  ;;  %1122 = vrot.lane.b32.xlu1 %v1055_v59, %s1719_s17 }
 0x1d6   : > { %1067 = vrot.lane.b32.xlu0 %v1055_v59, %s1712_s27  ;;  %1118 = vrot.lane.b32.xlu1 %v1053_v62, %s1719_s17 }
 0x1da   : > { %1035 = vrot.lane.b32.xlu1 %v1000_v7, %s1709_s24  ;;  %1063 = vrot.lane.b32.xlu0 %v1053_v62, %s1712_s27 }
 0x1de   : > { %1150 = vrot.lane.b32.xlu1 %v1000_v7, %s1718_s14  ;;  %1164 = vrot.lane.b32.xlu0 %v1053_v62, %s1720_s20 }
 0x1e2   : > { %1031 = vrot.lane.b32.xlu1 %v986_v19, %s1709_s24  ;;  %1103 = vrot.lane.b32.xlu0 %v1000_v7, %s1716_s12 }
 0x1e5   : > { %v1648_v23 = vpop.f32.mrb[4].mxu0 }
 0x1e6   : > { %v854_v24 = vmul.f32 %v1648_v23, %v2099_v17  ;;  %1105 = vrot.lane.b32.xlu1 %v1007_v22, %s1716_s12  ;;  %1099 = vrot.lane.b32.xlu0 %v986_v19, %s1716_s12  ;;  %v828_v25 = vpop.f32.mrb[5].mxu0  ;;  %v1696_v19 = vld [vmem:[%s2398_s3 + $0x8] sm:$0xff]  }
 0x1e7   : > { %v852_v26 = vmul.f32 %v2099_v17, %v828_v25  ;;  %v1649_v27 = vpop.f32.mrb[6].mxu0  ;;  %1652 = vmatprep.subr.bf16.mxu1 %v1696_v19 }
 0x1e8   : > { %v866_v28 = vadd.f32 %v2103_v18, %v854_v24  ;;  %v855_v29 = vmul.f32 %v1649_v27, %v2099_v17  ;;  %v831_v57 = vpop.f32.mrb[7].mxu0  ;;  %1653 = vmatpush3.bf16.msra.mxu1 %v1696_v19  ;;  %v1699_v27 = vld [vmem:[%s2398_s3 + $0x20] ss:$0 sps:$4 sm:$0xff]  }
 0x1e9   : > { %v864_v30 = vadd.f32 %v2103_v18, %v852_v26  ;;  %v853_v9 = vmul.f32 %v2099_v17, %v831_v57  ;;  %1654 = vmatprep.subr.bf16.mxu1 %v1697_v21 }
 0x1ea   : > { %v874_v32 = vmax.f32 %v866_v28, 0.0  ;;  %v867_v33 = vadd.f32 %v2103_v18, %v855_v29  ;;  %1152 = vrot.lane.b32.xlu0 %v1007_v22, %s1718_s14  ;;  %v1383_v29 = vsel %vm1381_vm0, %v1699_v27, 0 }
 0x1eb   : > { %v872_v54 = vmax.f32 %v864_v30, 0.0  ;;  %v865_v34 = vadd.f32 %v2103_v18, %v853_v9 }
 0x1ec   : > { %v1618_v35 = vpack.c.bf16 %v874_v32, %v874_v32  ;;  %v875_v38 = vmax.f32 %v867_v33, 0.0  ;;  %1655 = vmatpush3.bf16.msra.mxu1 %v1697_v21 }
 0x1ed   : > { %v1616_v36 = vpack.c.bf16 %v872_v54, %v872_v54  ;;  %v873_v52 = vmax.f32 %v865_v34, 0.0  ;;  %1656 = vmatprep.subr.bf16.mxu1 %v1698_v3  ;;  %v2272_v54 = vpop.permute.xlu1 %1146  ;;  %v1030_v34 = vpop.permute.xlu0 %1029 }
 0x1ee   : > { %v943_v37 = vshrl.u32 %v1618_v35, 16  ;;  %1037 = vrot.lane.b32.xlu0 %v1007_v22, %s1709_s24  ;;  %v946_v55 = vshll.u32 %v1618_v35, 16  ;;  %v1619_v40 = vpack.c.bf16 %v875_v38, %v875_v38 }
 0x1ef   : > { %v929_v39 = vshrl.u32 %v1616_v36, 16  ;;  %v932_v10 = vshll.u32 %v1616_v36, 16  ;;  %v1617_v59 = vpack.c.bf16 %v873_v52, %v873_v52 }
 0x1f0   : > { %v945_v61 = vrot.slane %v943_v37, 7  ;;  %v950_v45 = vshrl.u32 %v1619_v40, 16  ;;  %v953_v50 = vshll.u32 %v1619_v40, 16  ;;  %1657 = vmatpush3.bf16.msra.mxu1 %v1698_v3 }
 0x1f1   : > { %v931_v63 = vrot.slane %v929_v39, 7  ;;  %v936_v62 = vshrl.u32 %v1617_v59, 16  ;;  %v939_v8 = vshll.u32 %v1617_v59, 16  ;;  %1669 = vmatprep.subr.msk.bf16.mxu1 %vm1381_vm0, %v1699_v27 }
 0x1f2   : > { %v948_v17 = vor.u32 %v946_v55, %v945_v61  ;;  %v952_v48 = vrot.slane %v950_v45, 7  ;;  %v2280_v61 = vpop.permute.xlu1 %1162  ;;  %v1060_v55 = vpop.permute.xlu0 %1059 }
 0x1f3   : > { %v934_v44 = vor.u32 %v932_v10, %v931_v63  ;;  %v938_v7 = vrot.slane %v936_v62, 7 }
 0x1f4   : > { %v970_v41 = vsel %vm1759_vm3, 0, %v948_v17  ;;  %v955_v49 = vor.u32 %v953_v50, %v952_v48  ;;  %1659 = vmatpush3.bf16.msra.mxu1 %v1383_v29 }
 0x1f5   : > { %v2193_v18 = vsel %vm1763_vm5, %v970_v41, 0  ;;  %v968_v53 = vsel %vm1759_vm3, 0, %v934_v44  ;;  %v941_v16 = vor.u32 %v939_v8, %v938_v7 }
 0x1f6   : > { %1142 = vrot.lane.b32.xlu1 %v2193_v18, %s1717_s13  ;;  %1088 = vrot.lane.b32.xlu0 %v2193_v18, %s1714_s29  ;;  %v2206_v56 = vsel %vm1763_vm5, %v968_v53, 0  ;;  %v2212_v60 = vrot.slane %v2193_v18, 1  ;;  %v971_v1 = vsel %vm1759_vm3, 0, %v955_v49  ;;  %v1025_v24 = vshll.u32 %v2193_v18, 16 }
 0x1f7   : > { %v2222_v4 = vsel %vm1763_vm5, %v971_v1, 0  ;;  %v1056_v11 = vrot.slane %v2206_v56, 1  ;;  %v969_v20 = vsel %vm1759_vm3, 0, %v941_v16  ;;  %v1011_v26 = vshll.u32 %v2206_v56, 16 }
 0x1f8   : > { %v2247_v22 = vsel %vm1763_vm5, %v969_v20, 0  ;;  %v1115_v2 = vrot.slane %v2222_v4, 1  ;;  %v1027_v25 = vrot.slane %v1025_v24, 1  ;;  %v1023_v28 = vshrl.u32 %v2193_v18, 16 }
 0x1f9   : > { %v1057_v23 = vrot.slane %v2247_v22, 1  ;;  %v1013_v30 = vrot.slane %v1011_v26, 1  ;;  %v1095_v9 = vshll.u32 %v2222_v4, 16  ;;  %v1009_v32 = vshrl.u32 %v2206_v56, 16 }
 0x1fa   : > { %1101 = vrot.lane.b32.xlu1 %v993_v47, %s1716_s12  ;;  %1033 = vrot.lane.b32.xlu0 %v993_v47, %s1709_s24  ;;  %v1028_v57 = vor.u32 %v1027_v25, %v1023_v28  ;;  %v1018_v36 = vshll.u32 %v2247_v22, 16  ;;  %v1093_v37 = vshrl.u32 %v2222_v4, 16  ;;  %v1016_v31 = vshrl.u32 %v2247_v22, 16 }
 0x1fb   : > { %v1014_v33 = vor.u32 %v1013_v30, %v1009_v32  ;;  %v1097_v35 = vrot.slane %v1095_v9, 1  ;;  %v1181_v24 = vsel %vm602_vm8, %v1773_v5, %v1030_v34  ;;  %vm1278_vm3 = vcmask 457728  }
 0x1fc   : > { %v1020_v39 = vrot.slane %v1018_v36, 1  ;;  %v1197_v3 = vsel %vm636_vm10, %v1181_v24, %v1060_v55  ;;  %vm1368_vm5 = vcmask 588800  }
 0x1fd   : > { %v1098_v38 = vor.u32 %v1097_v35, %v1093_v37 }
 0x1fe   : > { %1148 = vrot.lane.b32.xlu0 %v993_v47, %s1718_s14  ;;  %1138 = vrot.lane.b32.xlu1 %v2206_v56, %s1717_s13  ;;  %v1021_v17 = vor.u32 %v1020_v39, %v1016_v31 }
 0x202   : > { %1084 = vrot.lane.b32.xlu0 %v2206_v56, %s1714_s29  ;;  %1073 = vrot.lane.b32.xlu1 %v2212_v60, %s1712_s27 }
 0x206   : > { %1128 = vrot.lane.b32.xlu0 %v2212_v60, %s1719_s17  ;;  %1090 = vrot.lane.b32.xlu1 %v2222_v4, %s1714_s29 }
 0x20a   : > { %1144 = vrot.lane.b32.xlu0 %v2222_v4, %s1717_s13  ;;  %1170 = vrot.lane.b32.xlu1 %v1056_v11, %s1720_s20 }
 0x20e   : > { %1124 = vrot.lane.b32.xlu0 %v1056_v11, %s1719_s17  ;;  %1069 = vrot.lane.b32.xlu1 %v1056_v11, %s1712_s27 }
 0x212   : > { %1140 = vrot.lane.b32.xlu0 %v2247_v22, %s1717_s13  ;;  %1086 = vrot.lane.b32.xlu1 %v2247_v22, %s1714_s29 }
 0x216   : > { %1130 = vrot.lane.b32.xlu1 %v1115_v2, %s1719_s17  ;;  %1071 = vrot.lane.b32.xlu0 %v1057_v23, %s1712_s27 }
 0x21a   : > { %1126 = vrot.lane.b32.xlu1 %v1057_v23, %s1719_s17  ;;  %1172 = vrot.lane.b32.xlu0 %v1057_v23, %s1720_s20 }
 0x21e   : > { %1043 = vrot.lane.b32.xlu1 %v1028_v57, %s1709_s24  ;;  %1111 = vrot.lane.b32.xlu0 %v1028_v57, %s1716_s12 }
 0x222   : > { %1158 = vrot.lane.b32.xlu1 %v1028_v57, %s1718_s14  ;;  %1107 = vrot.lane.b32.xlu0 %v1014_v33, %s1716_s12 }
 0x226   : > { %1154 = vrot.lane.b32.xlu1 %v1014_v33, %s1718_s14  ;;  %1160 = vrot.lane.b32.xlu0 %v1098_v38, %s1718_s14 }
 0x22a   : > { %1039 = vrot.lane.b32.xlu1 %v1014_v33, %s1709_s24  ;;  %1041 = vrot.lane.b32.xlu0 %v1021_v17, %s1709_s24 }
 0x22c   : > { %v1135_v63 = vpop.permute.xlu1 %1134  ;;  %v1081_v40 = vpop.permute.xlu0 %1080 }
 0x22e   : > { %1113 = vrot.lane.b32.xlu1 %v1098_v38, %s1716_s12  ;;  %1156 = vrot.lane.b32.xlu0 %v1021_v17, %s1718_s14 }
 0x230   : > { %v1066_v10 = vpop.permute.xlu1 %1065  ;;  %v1077_v41 = vpop.permute.xlu0 %1076 }
 0x231   : > { %v1213_v28 = vsel %vm670_vm12, %v1197_v3, %v1077_v41 }
 0x232   : > { %1109 = vrot.lane.b32.xlu1 %v1021_v17, %s1716_s12  ;;  %1176 = vrot.lane.b32.xlu0 %v1115_v2, %s1720_s20 }
 0x234   : > { %v1083_v43 = vpop.permute.xlu1 %1082  ;;  %v1121_v44 = vpop.permute.xlu0 %1120 }
 0x236   : > { %1174 = vrot.lane.b32.xlu1 %v2212_v60, %s1720_s20 }
 0x238   : > { %v1167_v45 = vpop.permute.xlu1 %1166  ;;  %v1137_v0 = vpop.permute.xlu0 %1136 }
 0x23a   : > { %1178 = vrot.lane.b32.xlu1 %v1776_v6, %s1720_s20 }
 0x23c   : > { %v1062_v47 = vpop.permute.xlu1 %1061  ;;  %v1117_v48 = vpop.permute.xlu0 %1116 }
 0x240   : > { %v1079_v52 = vpop.permute.xlu1 %1078  ;;  %v1133_v53 = vpop.permute.xlu0 %1132 }
 0x244   : > { %v1123_v50 = vpop.permute.xlu1 %1122  ;;  %v1169_v49 = vpop.permute.xlu0 %1168 }
 0x248   : > { %v1119_v59 = vpop.permute.xlu1 %1118  ;;  %v2293_v62 = vpop.permute.xlu0 %1067 }
 0x24c   : > { %v1036_v1 = vpop.permute.xlu1 %1035  ;;  %v1064_v4 = vpop.permute.xlu0 %1063 }
 0x24d   : > { %v1187_v7 = vsel %vm602_vm8, %v2117_v42, %v1036_v1 }
 0x24e   : > { %v1203_v60 = vsel %vm636_vm10, %v1187_v7, %v1066_v10 }
 0x24f   : > { %v1219_v8 = vsel %vm670_vm12, %v1203_v60, %v1083_v43 }
 0x250   : > { %v1151_v11 = vpop.permute.xlu1 %1150  ;;  %v1165_v6 = vpop.permute.xlu0 %1164 }
 0x254   : > { %v1032_v14 = vpop.permute.xlu1 %1031  ;;  %v1104_v16 = vpop.permute.xlu0 %1103 }
 0x255   : > { %v1183_v25 = vsel %vm602_vm8, %v2128_v46, %v1032_v14 }
 0x256   : > { %v1199_v29 = vsel %vm636_vm10, %v1183_v25, %v1062_v47 }
 0x257   : > { %v1215_v30 = vsel %vm670_vm12, %v1199_v29, %v1079_v52 }
 0x258   : > { %v1106_v19 = vpop.permute.xlu1 %1105  ;;  %v1100_v20 = vpop.permute.xlu0 %1099 }
 0x259   : > { %v1235_v21 = vsel %vm704_vm14, %v1219_v8, %v1106_v19  ;;  %v1229_v57 = vsel %vm704_vm14, %v1213_v28, %v1100_v20 }
 0x25a   : > { %v1252_v2 = vsel %vm1244_vm1, %v1235_v21, %v1123_v50  ;;  %v1246_v32 = vsel %vm1244_vm1, %v1229_v57, %v1117_v48 }
 0x25b   : > { %v1263_v55 = vsel %vm1261_vm2, %v1246_v32, %v1133_v53 }
 0x25c   : > { %v1153_v23 = vpop.permute.xlu0 %1152 }
 0x260   : > { %v1038_v42 = vpop.permute.xlu0 %1037 }
 0x261   : > { %v1189_v3 = vsel %vm602_vm8, %v2137_v51, %v1038_v42 }
 0x268   : > { %v2306_v26 = vpop.permute.xlu1 %1142  ;;  %v2308_v27 = vpop.permute.xlu0 %1088 }
 0x26c   : > { %v1102_v5 = vpop.permute.xlu1 %1101  ;;  %v1034_v9 = vpop.permute.xlu0 %1033 }
 0x26d   : > { %v1231_v33 = vsel %vm704_vm14, %v1215_v30, %v1102_v5  ;;  %v1185_v46 = vsel %vm602_vm8, %v2152_v58, %v1034_v9  ;;  %v1205_v5 = vsel %vm636_vm10, %v1189_v3, %v2293_v62 }
 0x26e   : > { %v1248_v34 = vsel %vm1244_vm1, %v1231_v33, %v1119_v59  ;;  %v1201_v35 = vsel %vm636_vm10, %v1185_v46, %v1064_v4 }
 0x26f   : > { %v1265_v36 = vsel %vm1261_vm2, %v1248_v34, %v1135_v63  ;;  %v1217_v37 = vsel %vm670_vm12, %v1201_v35, %v1081_v40 }
 0x270   : > { %v1233_v38 = vsel %vm704_vm14, %v1217_v37, %v1104_v16  ;;  %v1139_v39 = vpop.permute.xlu1 %1138  ;;  %v1149_v31 = vpop.permute.xlu0 %1148  ;;  %v1282_v17 = vsel %vm1278_vm3, %v1265_v36, %v1151_v11 }
 0x271   : > { %v1250_v58 = vsel %vm1244_vm1, %v1233_v38, %v1121_v44  ;;  %v1280_v10 = vsel %vm1278_vm3, %v1263_v55, %v1149_v31  ;;  %v1299_v41 = vsel %vm1295_vm4, %v1282_v17, %v1167_v45 }
 0x272   : > { %v1297_v43 = vsel %vm1295_vm4, %v1280_v10, %v1165_v6  ;;  %v1267_v63 = vsel %vm1261_vm2, %v1250_v58, %v1137_v0 }
 0x273   : > { %v1596_v40 = vcombine.low %v1297_v43, %v1299_v41  ;;  %v1284_v47 = vsel %vm1278_vm3, %v1267_v63, %v1153_v23 }
 0x274   : > { %v1074_v48 = vpop.permute.xlu1 %1073  ;;  %v1085_v52 = vpop.permute.xlu0 %1084  ;;  %v1301_v53 = vsel %vm1295_vm4, %v1284_v47, %v1169_v49  ;;  %v1269_v49 = vsel %vm1261_vm2, %v1252_v2, %v1139_v39 }
 0x275   : > { %1660 = vmatprep.mubr.msk.bf16.mxu1 %vm1368_vm5, %v1596_v40  ;;  %v1221_v9 = vsel %vm670_vm12, %v1205_v5, %v1085_v52 }
 0x278   : > { %v1091_v50 = vpop.permute.xlu1 %1090  ;;  %v1129_v44 = vpop.permute.xlu0 %1128 }
 0x27c   : > { %v1171_v59 = vpop.permute.xlu1 %1170  ;;  %v1145_v1 = vpop.permute.xlu0 %1144 }
 0x280   : > { %v1070_v4 = vpop.permute.xlu1 %1069  ;;  %v1125_v45 = vpop.permute.xlu0 %1124 }
 0x284   : > { %v1087_v7 = vpop.permute.xlu1 %1086  ;;  %v1141_v60 = vpop.permute.xlu0 %1140 }
 0x288   : > { %v1131_v8 = vpop.permute.xlu1 %1130  ;;  %v1072_v11 = vpop.permute.xlu0 %1071 }
 0x28c   : > { %v1127_v0 = vpop.permute.xlu1 %1126  ;;  %v1173_v6 = vpop.permute.xlu0 %1172 }
 0x290   : > { %v1044_v14 = vpop.permute.xlu1 %1043  ;;  %v1112_v16 = vpop.permute.xlu0 %1111 }
 0x291   : > { %v1195_v29 = vsel %vm602_vm8, %v2193_v18, %v1044_v14 }
 0x292   : > { %v1211_v32 = vsel %vm636_vm10, %v1195_v29, %v1074_v48 }
 0x293   : > { %v1227_v35 = vsel %vm670_vm12, %v1211_v32, %v1091_v50 }
 0x294   : > { %v1159_v19 = vpop.permute.xlu1 %1158  ;;  %v1108_v20 = vpop.permute.xlu0 %1107 }
 0x295   : > { %v1237_v18 = vsel %vm704_vm14, %v1221_v9, %v1108_v20 }
 0x296   : > { %v1254_v34 = vsel %vm1244_vm1, %v1237_v18, %v1125_v45 }
 0x297   : > { %v1271_v55 = vsel %vm1261_vm2, %v1254_v34, %v1141_v60 }
 0x298   : > { %v1155_v21 = vpop.permute.xlu1 %1154  ;;  %v1161_v23 = vpop.permute.xlu0 %1160 }
 0x299   : > { %v1286_v24 = vsel %vm1278_vm3, %v1269_v49, %v1155_v21 }
 0x29a   : > { %v1303_v25 = vsel %vm1295_vm4, %v1286_v24, %v1171_v59 }
 0x29b   : > { %v1597_v28 = vcombine.low %v1301_v53, %v1303_v25 }
 0x29c   : > { %v1040_v57 = vpop.permute.xlu1 %1039  ;;  %v1042_v30 = vpop.permute.xlu0 %1041 }
 0x29d   : > { %v1193_v2 = vsel %vm602_vm8, %v2247_v22, %v1042_v30  ;;  %1661 = vmatmul.mubr.msk.bf16.vlgmr.msra.gmra.mrb[0].mxu1 %vm1368_vm5, %v1597_v28  ;;  %v1191_v51 = vsel %vm602_vm8, %v2206_v56, %v1040_v57 }
 0x29e   : > { %v1209_v42 = vsel %vm636_vm10, %v1193_v2, %v1072_v11  ;;  %v1207_v46 = vsel %vm636_vm10, %v1191_v51, %v1070_v4 }
 0x29f   : > { %v1225_v33 = vsel %vm670_vm12, %v1209_v42, %v2308_v27  ;;  %v1223_v37 = vsel %vm670_vm12, %v1207_v46, %v1087_v7 }
 0x2a0   : > { %v1114_v62 = vpop.permute.xlu1 %1113  ;;  %v1241_v22 = vsel %vm704_vm14, %v1225_v33, %v1112_v16  ;;  %v1157_v36 = vpop.permute.xlu0 %1156 }
 0x2a1   : > { %v1243_v56 = vsel %vm704_vm14, %v1227_v35, %v1114_v62  ;;  %v1258_v39 = vsel %vm1244_vm1, %v1241_v22, %v1129_v44  ;;  %v1288_v17 = vsel %vm1278_vm3, %v1271_v55, %v1157_v36 }
 0x2a2   : > { %v1260_v31 = vsel %vm1244_vm1, %v1243_v56, %v1131_v8  ;;  %v1275_v10 = vsel %vm1261_vm2, %v1258_v39, %v1145_v1  ;;  %v1305_v40 = vsel %vm1295_vm4, %v1288_v17, %v1173_v6 }
 0x2a3   : > { %v1277_v48 = vsel %vm1261_vm2, %v1260_v31, %v2272_v54  ;;  %v1292_v52 = vsel %vm1278_vm3, %v1275_v10, %v1161_v23  ;;  %v1450_v54 = vld [vmem:[%s2399_s4] sm:$0x3] }
 0x2a4   : > { %v1110_v38 = vpop.permute.xlu1 %1109  ;;  %v1177_v53 = vpop.permute.xlu0 %1176  ;;  %v1294_v44 = vsel %vm1278_vm3, %v1277_v48, %v2280_v61  ;;  %v1454_v45 = vrot.slane %v1450_v54, %v846_v13  ;;  %v1466_v61 = vrot.slane %v1450_v54, %v858_v15 }
 0x2a5   : > { %v1239_v27 = vsel %vm704_vm14, %v1223_v37, %v1110_v38 }
 0x2a6   : > { %v1256_v58 = vsel %vm1244_vm1, %v1239_v27, %v1127_v0 }
 0x2a7   : > { %v1273_v41 = vsel %vm1261_vm2, %v1256_v58, %v2306_v26  ;;  %v1309_v26 = vsel %vm1295_vm4, %v1292_v52, %v1177_v53 }
 0x2a8   : > { %v1290_v43 = vsel %vm1278_vm3, %v1273_v41, %v1159_v19  ;;  %v1175_v63 = vpop.permute.xlu1 %1174 }
 0x2a9   : > { %v1307_v47 = vsel %vm1295_vm4, %v1290_v43, %v1175_v63 }
 0x2aa   : > { %v1598_v50 = vcombine.low %v1305_v40, %v1307_v47 }
 0x2ac   : > { %v1179_v59 = vpop.permute.xlu1 %1178  ;;  %1664 = vmatprep.mubr.msk.bf16.mxu1 %vm1368_vm5, %v1598_v50 }
 0x2ad   : > { %v1311_v1 = vsel %vm1295_vm4, %v1294_v44, %v1179_v59 }
 0x2ae   : > { %v1599_v4 = vcombine.low %v1309_v26, %v1311_v1 }
 0x2b0   : > { %1665 = vmatmul.mubr.msk.bf16.gmra.mrb[4].mxu1 %vm1368_vm5, %v1599_v4 }
 0x370   : > { %v1662_v7 = vpop.f32.mrb[0].mxu1 }
 0x371   : > { %v1419_v60 = vpop.f32.mrb[1].mxu1  ;;  %v1457_v16 = vmul.f32 %v1662_v7, %v1454_v45 }
 0x372   : > { %v1455_v8 = vmul.f32 %v1454_v45, %v1419_v60  ;;  %v1663_v11 = vpop.f32.mrb[2].mxu1 }
 0x373   : > { %v1422_v0 = vpop.f32.mrb[3].mxu1  ;;  %v1469_v49 = vadd.f32 %v1466_v61, %v1457_v16  ;;  %v1458_v21 = vmul.f32 %v1663_v11, %v1454_v45 }
 0x374   : > { %v1467_v6 = vadd.f32 %v1466_v61, %v1455_v8  ;;  %v1456_v14 = vmul.f32 %v1454_v45, %v1422_v0 }
 0x375   : > { %v1477_v24 = vmax.f32 %v1469_v49, 0.0  ;;  %v1470_v13 = vadd.f32 %v1466_v61, %v1458_v21 }
 0x376   : > { %v1475_v19 = vmax.f32 %v1467_v6, 0.0  ;;  %v1468_v20 = vadd.f32 %v1466_v61, %v1456_v14 }
 0x377   : > { %v1478_v3 = vmax.f32 %v1470_v13, 0.0 }
 0x378   : > { %1483 = vxpose.xlu0.b32.start [1/8] (short) (narrow) %v1475_v19, 8  ;;  %v1476_v23 = vmax.f32 %v1468_v20, 0.0 }
 0x37c   : > { %1484 = vxpose.xlu0.b32.cont [2/8] (short) (narrow) %v1476_v23, 8 }
 0x380   : > { %1485 = vxpose.xlu0.b32.cont [3/8] (short) (narrow) %v1477_v24, 8 }
 0x383   : > { %v1666_v12 = vpop.f32.mrb[4].mxu1 }
 0x384   : > { %1486 = vxpose.xlu0.b32.cont [4/8] (short) (narrow) %v1478_v3, 8  ;;  %v1435_v15 = vpop.f32.mrb[5].mxu1  ;;  %v1461_v5 = vmul.f32 %v1666_v12, %v1454_v45 }
 0x385   : > { %v1459_v25 = vmul.f32 %v1454_v45, %v1435_v15  ;;  %v1667_v28 = vpop.f32.mrb[6].mxu1 }
 0x386   : > { %v1438_v29 = vpop.f32.mrb[7].mxu1  ;;  %v1473_v51 = vadd.f32 %v1466_v61, %v1461_v5  ;;  %v1462_v42 = vmul.f32 %v1667_v28, %v1454_v45 }
 0x387   : > { %v1471_v57 = vadd.f32 %v1466_v61, %v1459_v25  ;;  %v1460_v30 = vmul.f32 %v1454_v45, %v1438_v29 }
 0x388   : > { %v1481_v18 = vmax.f32 %v1473_v51, 0.0  ;;  %v1474_v33 = vadd.f32 %v1466_v61, %v1462_v42 }
 0x389   : > { %v1479_v2 = vmax.f32 %v1471_v57, 0.0  ;;  %v1472_v9 = vadd.f32 %v1466_v61, %v1460_v30 }
 0x38a   : > { %v1482_v62 = vmax.f32 %v1474_v33, 0.0 }
 0x38b   : > { %1487 = vxpose.xlu0.b32.cont [5/8] (short) (narrow) %v1479_v2, 8  ;;  %v1480_v32 = vmax.f32 %v1472_v9, 0.0 }
 0x38f   : > { %1488 = vxpose.xlu0.b32.cont [6/8] (short) (narrow) %v1480_v32, 8 }
 0x393   : > { %1489 = vxpose.xlu0.b32.cont [7/8] (short) (narrow) %v1481_v18, 8 }
 0x397   : > { %1490 = vxpose.xlu0.b32.end [8/8] (short) (narrow) %v1482_v62, 8 }
 0x3fb   : > { %v1499_v46 = vpop.trf.xlu0 }
 0x3fc   : > { %1515 = vst.msk [vmem:[%s222_s11] sm:$0xff] %vm1295_vm4, %v1499_v46 }
 0x3fd PF: > { %s15_s18 = sadd.s32 1, %s1706_s18  }
 0x3fe   : > { %p12_p4 = scmp.ge.s32.totalorder %s15_s18, 4  }
 0x400   :  { %14 = sbr.rel (!%p12_p4) target bundleno = 1 (0x1), region = 70 }

</bundles_post_ra>
